<compile_context>
chip_gen: v5e
topology: v5e:2x2
jax: 0.10.0
libtpu: 0.0.40
codegen_flags: <defaults>
</compile_context>

<pallas_src>
import functools
import math

import jax
import jax.numpy as jnp
from jax import lax
from jax.experimental import pallas as pl
from jax.experimental.pallas import tpu as pltpu

_LANES = 512           # lane-dense minor dim (multiple of 128)
_TILE_ROWS_MAX = 2048  # 2048 x 512 x 4B = 4 MiB per f32 input tile
_ACC_ROWS = 256        # fixed accumulator height (decoupled from tile size)
_NUM_PARTIALS = 2      # leading "parallel" axis (both TensorCores on v7x)


def _round_up(x, m):
    return ((x + m - 1) // m) * m


def _bce_partial_kernel(pred_ref, target_ref, out_ref, acc_ref, *,
                        rows, tile_rows, acc_rows, folds, inv_n, masked):
    c = pl.program_id(0)
    k = pl.program_id(1)
    nk = pl.num_programs(1)

    @pl.when(k == 0)
    def _():
        acc_ref[...] = jnp.zeros_like(acc_ref)

    # Valid rows remaining in this *logical* block. <= 0 for clamped duplicate
    # blocks past the end of the array; >= tile_rows when the block is full.
    row_limit = rows - (c * nk + k) * tile_rows

    @pl.loop(0, folds)
    def _(f):
        r0 = pl.multiple_of(f * acc_rows, acc_rows)
        p = pred_ref[pl.ds(r0, acc_rows), :].astype(jnp.float32)
        t = target_ref[pl.ds(r0, acc_rows), :].astype(jnp.float32)
        if masked:
            # Mask garbage rows BEFORE the logs; p=1, t=1 contributes exactly
            # 0 loss after the -100 clamp.
            ridx = lax.broadcasted_iota(jnp.int32, (acc_rows, _LANES), 0)
            valid = ridx < (row_limit - r0)
            p = jnp.where(valid, p, 1.0)
            t = jnp.where(valid, t, 1.0)
        # PyTorch BCELoss clamps each log term at -100 (finite at p in {0,1}).
        log_p = jnp.maximum(jnp.log(p), -100.0)
        log_1mp = jnp.maximum(jnp.log1p(-p), -100.0)
        # -(t*log(p) + (1-t)*log(1-p)) == -(log_1mp + t*(log_p - log_1mp))
        acc_ref[...] -= log_1mp + t * (log_p - log_1mp)

    @pl.when(k == nk - 1)
    def _():
        # Single cross-lane/sublane reduce + scale, once per partial; written
        # as a full (8,128) tile so the store is unmasked and lane-dense.
        out_ref[...] = jnp.full(out_ref.shape,
                                jnp.sum(acc_ref[...]) * inv_n, jnp.float32)


def bce_loss(pred, target):
    """Equivalent of BCELoss.forward(pred, target) (weight=None, mean reduction).

    pred, target: same shape (any rank), values in [0, 1]. Returns f32 scalar.
    """
    total = math.prod(pred.shape)
    padded_total = _round_up(total, _LANES)
    rows = padded_total // _LANES

    pred_flat = pred.reshape(-1)
    target_flat = target.reshape(-1)
    if padded_total != total:
        # Rare (<512-element) lane-tail pad only; pred=1, target=1 -> 0 loss.
        pad = padded_total - total
        pred_flat = jnp.pad(pred_flat, (0, pad), constant_values=1.0)
        target_flat = jnp.pad(target_flat, (0, pad), constant_values=1.0)
    pred2d = pred_flat.reshape(rows, _LANES)
    target2d = target_flat.reshape(rows, _LANES)

    # Tile sizing: large DMA tiles, small fixed accumulator.
    if rows <= _ACC_ROWS:
        tile_rows = _round_up(rows, 8)
        acc_rows = tile_rows
    else:
        tile_rows = min(_TILE_ROWS_MAX, _round_up(rows, _ACC_ROWS))
        acc_rows = _ACC_ROWS
    folds = tile_rows // acc_rows

    num_row_blocks = -(-rows // tile_rows)
    num_partials = _NUM_PARTIALS if num_row_blocks > 1 else 1
    chunks = -(-num_row_blocks // num_partials)
    last_block = num_row_blocks - 1
    # Masking is only compiled in when the grid over-covers the real rows.
    masked = (num_partials * chunks * tile_rows) != rows

    inv_n = 1.0 / float(total)  # divide by TOTAL (unpadded) element count

    def in_map(c, k):
        # Clamp so blocks past the end re-read the last valid block; their
        # contribution is masked to zero inside the kernel.
        return (jnp.minimum(c * chunks + k, last_block), 0)

    kernel = functools.partial(
        _bce_partial_kernel, rows=rows, tile_rows=tile_rows,
        acc_rows=acc_rows, folds=folds, inv_n=inv_n, masked=masked)

    partials = pl.pallas_call(
        kernel,
        out_shape=jax.ShapeDtypeStruct((num_partials, 8, 128), jnp.float32),
        grid_spec=pltpu.PrefetchScalarGridSpec(
            num_scalar_prefetch=0,
            grid=(num_partials, chunks),
            in_specs=[
                pl.BlockSpec((tile_rows, _LANES), in_map),
                pl.BlockSpec((tile_rows, _LANES), in_map),
            ],
            out_specs=pl.BlockSpec((1, 8, 128), lambda c, k: (c, 0, 0)),
            scratch_shapes=[pltpu.VMEM((acc_rows, _LANES), jnp.float32)],
        ),
        compiler_params=pltpu.CompilerParams(
            dimension_semantics=("parallel", "arbitrary"),
            vmem_limit_bytes=32 * 1024 * 1024,
        ),
    )(pred2d, target2d)

    return jnp.sum(partials[:, 0, 0])


if __name__ == "__main__":
    key = jax.random.PRNGKey(0)
    k1, k2 = jax.random.split(key)

    # Small NCHW inputs, consistent with a segmentation-style BCE usage.
    shape = (2, 4, 16, 16)
    pred = jax.nn.sigmoid(jax.random.normal(k1, shape, dtype=jnp.float32))
    target = (jax.random.uniform(k2, shape) > 0.5).astype(jnp.float32)

    loss = jax.block_until_ready(bce_loss(pred, target))

    # Reference check (plain JAX), not printed.
    p = pred.reshape(shape[0], -1)
    t = target.reshape(shape[0], -1)
    ref = jnp.mean(
        -(t * jnp.maximum(jnp.log(p), -100.0)
          + (1.0 - t) * jnp.maximum(jnp.log1p(-p), -100.0))
    )
    assert jnp.allclose(loss, ref, rtol=1e-5, atol=1e-6), (loss, ref)

    print("KERNEL_OK")
</pallas_src>

<mosaic_0001>
module attributes {stable_mosaic.version = 11 : i64} {
  func.func @_bce_partial_kernel(%arg0: i32, %arg1: i32, %arg2: memref<8x512xf32, #tpu.memory_space<vmem>>, %arg3: memref<8x512xf32, #tpu.memory_space<vmem>>, %arg4: memref<1x8x128xf32, #tpu.memory_space<vmem>>, %arg5: memref<8x512xf32, #tpu.memory_space<vmem>>) attributes {dimension_semantics = [#tpu.dimension_semantics<parallel>, #tpu.dimension_semantics<arbitrary>], iteration_bounds = array<i64: 1, 1>, scalar_prefetch = 0 : i64, scratch_operands = 1 : i64, tpu.core_type = #tpu.core_type<tc>, window_params = [{transform_indices = @transform_0, window_bounds = array<i64: 8, 512>}, {transform_indices = @transform_1, window_bounds = array<i64: 8, 512>}, {transform_indices = @transform_2, window_bounds = array<i64: 1, 8, 128>}]} {
    %c0_i32 = arith.constant 0 : i32
    %0 = arith.cmpi eq, %arg1, %c0_i32 : i32
    %1 = arith.extui %0 : i1 to i32
    %c0_i32_0 = arith.constant 0 : i32
    %2 = arith.cmpi ne, %1, %c0_i32_0 : i32
    scf.if %2 {
      %cst_17 = arith.constant 0.000000e+00 : f32
      %40 = vector.broadcast %cst_17 : f32 to vector<8x512xf32>
      %c0_18 = arith.constant 0 : index
      %c0_19 = arith.constant 0 : index
      %41 = vector.load %arg5[%c0_18, %c0_19] : memref<8x512xf32, #tpu.memory_space<vmem>>, vector<8x512xf32>
      tpu.vector_store %arg5[%c0_18, %c0_19], %40 {strides = array<i32>} : memref<8x512xf32, #tpu.memory_space<vmem>>, vector<8x512xf32>,
    } else {
    }
    %c1_i32 = arith.constant 1 : i32
    %3 = arith.muli %arg0, %c1_i32 : i32
    %4 = arith.addi %3, %arg1 : i32
    %c8_i32 = arith.constant 8 : i32
    %5 = arith.muli %4, %c8_i32 : i32
    %c4_i32 = arith.constant 4 : i32
    %6 = arith.subi %c4_i32, %5 : i32
    %c0_i32_1 = arith.constant 0 : i32
    %c1_i32_2 = arith.constant 1 : i32
    %7 = arith.muli %c0_i32_1, %c1_i32_2 : i32
    %c0_i32_3 = arith.constant 0 : i32
    %8 = arith.addi %c0_i32_3, %7 : i32
    %c8_i32_4 = arith.constant 8 : i32
    %9 = arith.muli %8, %c8_i32_4 : i32
    %10 = tpu.assume_multiple %9, 8 : i32
    %11 = arith.index_cast %10 : i32 to index
    %c0 = arith.constant 0 : index
    %12 = vector.load %arg2[%11, %c0] : memref<8x512xf32, #tpu.memory_space<vmem>>, vector<8x512xf32>
    %13 = arith.index_cast %10 : i32 to index
    %c0_5 = arith.constant 0 : index
    %14 = vector.load %arg3[%13, %c0_5] : memref<8x512xf32, #tpu.memory_space<vmem>>, vector<8x512xf32>
    %15 = tpu.iota {dimensions = array<i32: 0>} : vector<8x512xi32>
    %16 = arith.subi %6, %10 : i32
    %17 = vector.broadcast %16 : i32 to vector<8x512xi32>
    %18 = arith.cmpi slt, %15, %17 : vector<8x512xi32>
    %cst = arith.constant 1.000000e+00 : f32
    %19 = vector.broadcast %cst : f32 to vector<8x512xf32>
    %20 = arith.select %18, %12, %19 : vector<8x512xi1>, vector<8x512xf32>
    %cst_6 = arith.constant 1.000000e+00 : f32
    %21 = vector.broadcast %cst_6 : f32 to vector<8x512xf32>
    %22 = arith.select %18, %14, %21 : vector<8x512xi1>, vector<8x512xf32>
    %23 = math.log %20 : vector<8x512xf32>
    %cst_7 = arith.constant -1.000000e+02 : f32
    %24 = vector.broadcast %cst_7 : f32 to vector<8x512xf32>
    %25 = arith.maximumf %23, %24 : vector<8x512xf32>
    %cst_8 = arith.constant 0.000000e+00 : f32
    %26 = vector.broadcast %cst_8 : f32 to vector<8x512xf32>
    %27 = arith.subf %26, %20 : vector<8x512xf32>
    %28 = math.log1p %27 : vector<8x512xf32>
    %cst_9 = arith.constant -1.000000e+02 : f32
    %29 = vector.broadcast %cst_9 : f32 to vector<8x512xf32>
    %30 = arith.maximumf %28, %29 : vector<8x512xf32>
    %c0_10 = arith.constant 0 : index
    %c0_11 = arith.constant 0 : index
    %31 = vector.load %arg5[%c0_10, %c0_11] : memref<8x512xf32, #tpu.memory_space<vmem>>, vector<8x512xf32>
    %32 = arith.subf %25, %30 : vector<8x512xf32>
    %33 = arith.mulf %22, %32 : vector<8x512xf32>
    %34 = arith.addf %30, %33 : vector<8x512xf32>
    %35 = arith.subf %31, %34 : vector<8x512xf32>
    %c0_12 = arith.constant 0 : index
    %c0_13 = arith.constant 0 : index
    %36 = vector.load %arg5[%c0_12, %c0_13] : memref<8x512xf32, #tpu.memory_space<vmem>>, vector<8x512xf32>
    tpu.vector_store %arg5[%c0_12, %c0_13], %35 {strides = array<i32>} : memref<8x512xf32, #tpu.memory_space<vmem>>, vector<8x512xf32>,
    %c1_i32_14 = arith.constant 1 : i32
    %c0_i32_15 = arith.constant 0 : i32
    %37 = arith.cmpi eq, %arg1, %c0_i32_15 : i32
    %38 = arith.extui %37 : i1 to i32
    %c0_i32_16 = arith.constant 0 : i32
    %39 = arith.cmpi ne, %38, %c0_i32_16 : i32
    scf.if %39 {
      %c0_17 = arith.constant 0 : index
      %c0_18 = arith.constant 0 : index
      %40 = vector.load %arg5[%c0_17, %c0_18] : memref<8x512xf32, #tpu.memory_space<vmem>>, vector<8x512xf32>
      %41 = vector.shape_cast %40 : vector<8x512xf32> to vector<1x8x512xf32>
      %cst_19 = arith.constant dense<0.000000e+00> : vector<1xf32>
      %42 = vector.multi_reduction <add>, %41, %cst_19 [1, 2] : vector<1x8x512xf32> to vector<1xf32>
      %43 = vector.shape_cast %42 : vector<1xf32> to vector<1x1x1xf32>
      %44 = vector.extract %43[0, 0, 0] : f32 from vector<1x1x1xf32>
      %cst_20 = arith.constant 4.8828125E-4 : f32
      %45 = arith.mulf %44, %cst_20 : f32
      %46 = vector.broadcast %45 : f32 to vector<1x8x128xf32>
      %c0_21 = arith.constant 0 : index
      %c0_22 = arith.constant 0 : index
      %c0_23 = arith.constant 0 : index
      %47 = vector.load %arg4[%c0_21, %c0_22, %c0_23] : memref<1x8x128xf32, #tpu.memory_space<vmem>>, vector<1x8x128xf32>
      tpu.vector_store %arg4[%c0_21, %c0_22, %c0_23], %46 {strides = array<i32>} : memref<1x8x128xf32, #tpu.memory_space<vmem>>, vector<1x8x128xf32>,
    } else {
    }
    return
  }
  func.func @transform_0(%arg0: i32, %arg1: i32) -> (i32, i32) {
    %c1_i32 = arith.constant 1 : i32
    %0 = arith.muli %arg0, %c1_i32 : i32
    %1 = arith.addi %0, %arg1 : i32
    %c0_i32 = arith.constant 0 : i32
    %2 = arith.minsi %1, %c0_i32 : i32
    %c0_i32_0 = arith.constant 0 : i32
    %c0_i32_1 = arith.constant 0 : i32
    return %2, %c0_i32_0 : i32, i32
  }
  func.func @transform_1(%arg0: i32, %arg1: i32) -> (i32, i32) {
    %c1_i32 = arith.constant 1 : i32
    %0 = arith.muli %arg0, %c1_i32 : i32
    %1 = arith.addi %0, %arg1 : i32
    %c0_i32 = arith.constant 0 : i32
    %2 = arith.minsi %1, %c0_i32 : i32
    %c0_i32_0 = arith.constant 0 : i32
    %c0_i32_1 = arith.constant 0 : i32
    return %2, %c0_i32_0 : i32, i32
  }
  func.func @transform_2(%arg0: i32, %arg1: i32) -> (i32, i32, i32) {
    %c0_i32 = arith.constant 0 : i32
    %c0_i32_0 = arith.constant 0 : i32
    %c0_i32_1 = arith.constant 0 : i32
    return %arg0, %c0_i32, %c0_i32_0 : i32, i32, i32
  }
}

</mosaic_0001>

<bundles_post_ra>
// kernel: tpu_custom_call.1
= control target key start
LH: loop header
LB: loop body
LE: loop exit
PB: predicated region body
PF: predicated region fallthrough
CT: control target
= control target key end

     0   :  { %7 = vsyncpa [#allocation4], 0  ;;  %s450_s0 = inlined_call_operand.hbm [shape: f32[4,512], index: 0, kind: input, shape index: {}]   ;;  %s451_s1 = inlined_call_operand.hbm [shape: f32[4,512], index: 1, kind: input, shape index: {}]   ;;  %s452_s2 = inlined_call_operand.hbm [shape: f32[1,8,128], index: 2, kind: output, shape index: {}]  }
   0x1   :  { %8 = vsyncpa [#allocation7], 0 }
   0x2   :  { %9 = vsyncpa [#allocation5], 0 }
   0x3   :  { %21 = vsyncadd [#allocation4], 256  ;;  %s27_s11 = sshll.u32 %s450_s0, 4  ;;  %s384_s12 = smov [#allocation3]   ;;  %s28_s11 = int_to_ptr.hbm [resolvable:$true] %s27_s11 }
   0x4   :  { %s29_s13 = sshll.u32 %s384_s12, 4  ;;  %s385_s14 = smov 256   ;;  %s30_s13 = int_to_ptr.vmem [resolvable:$true] %s29_s13 }
   0x5   :  { %s386_s15 = smov 16  }
   0x6   :  { %35 = dma.hbm_to_vmem [thread:$0]  %s28_s11, 256, %s30_s13, [#allocation4], %s385_s14, %s385_s14, %s386_s15  }
   0x7   :  { %47 = vsyncadd [#allocation7], 256  ;;  %s53_s18 = sshll.u32 %s451_s1, 4  ;;  %s387_s19 = smov [#allocation6]   ;;  %s54_s18 = int_to_ptr.hbm [resolvable:$true] %s53_s18 }
   0x8   :  { %s55_s20 = sshll.u32 %s387_s19, 4  ;;  %s56_s20 = int_to_ptr.vmem [resolvable:$true] %s55_s20 }
   0x9   :  { %61 = dma.hbm_to_vmem [thread:$0]  %s54_s18, 256, %s56_s20, [#allocation7], %s385_s14, %s385_s14, %s386_s15  }
   0xa   :  { %378 = dma.done.wait [#allocation4], 512  }
   0xb   :  { %379 = vsyncadd [#allocation4], 4294966784 }
   0xc   :  { %380 = dma.done.wait [#allocation7], 512  }
   0xd   :  { %381 = vsyncadd [#allocation7], 4294966784  ;;  %v108_v0 = vlaneseq  ;;  %v98_v1 = vld [vmem:[#allocation3] sm:$0xff]  ;;  %v99_v2 = vld [vmem:[#allocation3 + $0x8] sm:$0xff]  ;;  %s388_s0 = smov [#allocation8]   ;;  %s268_s23 = sshll.u32 %s452_s2, 4  ;;  %s269_s23 = int_to_ptr.hbm [resolvable:$true] %s268_s23 }
   0xe   :  { %v100_v3 = vld [vmem:[#allocation3 + $0x10] sm:$0xff]  ;;  %v101_v4 = vld [vmem:[#allocation3 + $0x18] sm:$0xff]  ;;  %117 = vst [vmem:[#allocation1] ss:$2 sm:$0xff] %v98_v1  ;;  %v104_v6 = vld [vmem:[#allocation6] sm:$0xff]  ;;  %s266_s1 = sshll.u32 %s388_s0, 4  ;;  %s267_s1 = int_to_ptr.vmem [resolvable:$true] %s266_s1 }
   0xf   :  { %119 = vst [vmem:[#allocation1 + $0x1] ss:$2 sm:$0xff] %v100_v3  ;;  %v410_v5 = vshrl.u32 %v108_v0, 7  ;;  %v106_v7 = vld [vmem:[#allocation6 + $0x10] sm:$0xff]  ;;  %v105_v10 = vld [vmem:[#allocation6 + $0x8] sm:$0xff]  ;;  %v107_v11 = vld [vmem:[#allocation6 + $0x18] sm:$0xff] }
  0x10   :  { %121 = vst [vmem:[#allocation1 + $0x10] ss:$2 sm:$0xff] %v99_v2 }
  0x11   :  { %123 = vst [vmem:[#allocation1 + $0x11] ss:$2 sm:$0xff] %v101_v4  ;;  %vm112_vm0 = vcmp.lt.s32.totalorder %v410_v5, 4 }
  0x16   :  { %v124_v8 = vld.sshfl [vmem:[#allocation1] sm:$0xff pattern:$0x75316420]  ;;  %v125_v9 = vld.sshfl [vmem:[#allocation1 + $0x8] sm:$0xff pattern:$0x75316420] }
  0x17   :  { %v132_v12 = vsel %vm112_vm0, %v124_v8, 1.0  ;;  %v133_v13 = vsel %vm112_vm0, %v125_v9, 1.0  ;;  %140 = vst [vmem:[#allocation1] ss:$2 sm:$0xff] %v104_v6 }
  0x18   :  { %v126_v14 = vld.sshfl [vmem:[#allocation1 + $0x10] sm:$0xff pattern:$0x75316420]  ;;  %v127_v15 = vld.sshfl [vmem:[#allocation1 + $0x18] sm:$0xff pattern:$0x75316420]  ;;  %290 = vlog2.f32 %v132_v12 }
  0x19   :  { %v134_v16 = vsel %vm112_vm0, %v126_v14, 1.0  ;;  %142 = vst [vmem:[#allocation1 + $0x1] ss:$2 sm:$0xff] %v106_v7  ;;  %292 = vlog2.f32 %v133_v13  ;;  %v171_v17 = vsub.f32 0.0, %v132_v12  ;;  %v172_v18 = vsub.f32 0.0, %v133_v13 }
  0x1a   :  { %144 = vst [vmem:[#allocation1 + $0x10] ss:$2 sm:$0xff] %v105_v10  ;;  %294 = vlog2.f32 %v134_v16  ;;  %v173_v19 = vsub.f32 0.0, %v134_v16  ;;  %v135_v27 = vsel %vm112_vm0, %v127_v15, 1.0 }
  0x1b   :  { %146 = vst [vmem:[#allocation1 + $0x11] ss:$2 sm:$0xff] %v107_v11  ;;  %v175_v20 = vadd.f32 1.0, %v171_v17  ;;  %v178_v21 = vmul.f32 -0.5, %v171_v17  ;;  %v184_v22 = vadd.f32 1.0, %v172_v18  ;;  %v187_v23 = vmul.f32 -0.5, %v172_v18 }
  0x1c   :  { %v193_v24 = vadd.f32 1.0, %v173_v19  ;;  %v196_v25 = vmul.f32 -0.5, %v173_v19  ;;  %v181_v30 = vand.u32 2147483647, %v171_v17  ;;  %v190_v32 = vand.u32 2147483647, %v172_v18 }
  0x1d   :  { %296 = vlog2.f32 %v175_v20  ;;  %v179_v28 = vadd.f32 1.0, %v178_v21  ;;  %v188_v31 = vadd.f32 1.0, %v187_v23  ;;  %v174_v36 = vsub.f32 0.0, %v135_v27 }
  0x1e   :  { %v291_v26 = vpop.eup %290  ;;  %298 = vlog2.f32 %v184_v22  ;;  %v197_v35 = vadd.f32 1.0, %v196_v25  ;;  %v199_v37 = vand.u32 2147483647, %v173_v19  ;;  %vm421_vm1 = vcmp.lt.f32.partialorder %v181_v30, 0.0004427343 }
  0x1f   :  { %v293_v29 = vpop.eup %292  ;;  %300 = vlog2.f32 %v193_v24  ;;  %v160_v34 = vmul.f32 0.6931472, %v291_v26  ;;  %v180_v39 = vmul.f32 %v179_v28, %v171_v17  ;;  %v189_v43 = vmul.f32 %v188_v31, %v172_v18 }
  0x20   :  { %v295_v33 = vpop.eup %294  ;;  %v162_v38 = vmul.f32 0.6931472, %v293_v29  ;;  %302 = vlog2.f32 %v135_v27  ;;  %vm425_vm2 = vcmp.lt.f32.partialorder %v190_v32, 0.0004427343  ;;  %v198_v49 = vmul.f32 %v197_v35, %v173_v19 }
  0x21   :  { %v164_v41 = vmul.f32 0.6931472, %v295_v33  ;;  %v147_v46 = vld.sshfl [vmem:[#allocation1] sm:$0xff pattern:$0x75316420]  ;;  %v167_v47 = vmax.f32 %v160_v34, -100.0 }
  0x22   :  { %vm429_vm3 = vcmp.lt.f32.partialorder %v199_v37, 0.0004427343  ;;  %v202_v53 = vadd.f32 1.0, %v174_v36  ;;  %v205_v54 = vmul.f32 -0.5, %v174_v36  ;;  %v168_v56 = vmax.f32 %v162_v38, -100.0 }
  0x23   :  { %v297_v40 = vpop.eup %296  ;;  %v148_v55 = vld.sshfl [vmem:[#allocation1 + $0x8] sm:$0xff pattern:$0x75316420]  ;;  %v149_v59 = vld.sshfl [vmem:[#allocation1 + $0x10] sm:$0xff pattern:$0x75316420] }
  0x24   :  { %v299_v45 = vpop.eup %298  ;;  %v177_v48 = vmul.f32 0.6931472, %v297_v40  ;;  %v169_v60 = vmax.f32 %v164_v41, -100.0  ;;  %304 = vlog2.f32 %v202_v53  ;;  %v155_v0 = vsel %vm112_vm0, %v147_v46, 1.0 }
  0x25   :  { %v301_v50 = vpop.eup %300  ;;  %v186_v51 = vmul.f32 0.6931472, %v299_v45  ;;  %v206_v2 = vadd.f32 1.0, %v205_v54  ;;  %v156_v4 = vsel %vm112_vm0, %v148_v55, 1.0  ;;  %v208_v6 = vand.u32 2147483647, %v174_v36 }
  0x26   :  { %v183_v57 = vsel %vm421_vm1, %v180_v39, %v177_v48  ;;  %v195_v58 = vmul.f32 0.6931472, %v301_v50  ;;  %v303_v63 = vpop.eup %302  ;;  %v157_v9 = vsel %vm112_vm0, %v149_v59, 1.0  ;;  %v150_v21 = vld.sshfl [vmem:[#allocation1 + $0x18] sm:$0xff pattern:$0x75316420] }
  0x27   :  { %v192_v61 = vsel %vm425_vm2, %v189_v43, %v186_v51  ;;  %v211_v62 = vmax.f32 %v183_v57, -100.0  ;;  %v166_v11 = vmul.f32 0.6931472, %v303_v63  ;;  %v207_v14 = vmul.f32 %v206_v2, %v174_v36 }
  0x28   :  { %v201_v1 = vsel %vm429_vm3, %v198_v49, %v195_v58  ;;  %v212_v3 = vmax.f32 %v192_v61, -100.0  ;;  %vm209_vm4 = vcmp.lt.f32.partialorder %v208_v6, 0.0004427343  ;;  %v158_v28 = vsel %vm112_vm0, %v150_v21, 1.0 }
  0x29   :  { %v213_v7 = vmax.f32 %v201_v1, -100.0  ;;  %v219_v8 = vsub.f32 %v167_v47, %v211_v62  ;;  %v170_v22 = vmax.f32 %v166_v11, -100.0 }
  0x2a   :  { %v220_v10 = vsub.f32 %v168_v56, %v212_v3  ;;  %v305_v16 = vpop.eup %304 }
  0x2b   :  { %v221_v12 = vsub.f32 %v169_v60, %v213_v7  ;;  %v223_v13 = vmul.f32 %v219_v8, %v155_v0  ;;  %v204_v19 = vmul.f32 0.6931472, %v305_v16 }
  0x2c   :  { %v224_v15 = vmul.f32 %v220_v10, %v156_v4 }
  0x2d   :  { %v225_v17 = vmul.f32 %v221_v12, %v157_v9  ;;  %v227_v18 = vadd.f32 %v223_v13, %v211_v62  ;;  %v210_v25 = vsel %vm209_vm4, %v207_v14, %v204_v19 }
  0x2e   :  { %v228_v20 = vadd.f32 %v224_v15, %v212_v3  ;;  %v214_v27 = vmax.f32 %v210_v25, -100.0 }
  0x2f   :  { %v229_v23 = vadd.f32 %v225_v17, %v213_v7  ;;  %v231_v24 = vsub.f32 0.0, %v227_v18 }
  0x30   :  { %v232_v26 = vsub.f32 0.0, %v228_v20  ;;  %v222_v29 = vsub.f32 %v170_v22, %v214_v27 }
  0x31   :  { %v233_v30 = vsub.f32 0.0, %v229_v23 }
  0x32   :  { %v246_v31 = vadd.f32 %v232_v26, %v231_v24  ;;  %v226_v32 = vmul.f32 %v222_v29, %v158_v28 }
  0x34   :  { %v230_v33 = vadd.f32 %v226_v32, %v214_v27  ;;  %v247_v34 = vadd.f32 %v246_v31, %v233_v30 }
  0x36   :  { %v234_v35 = vsub.f32 0.0, %v230_v33 }
  0x38   :  { %v248_v36 = vadd.f32 %v247_v34, %v234_v35 }
  0x3a   :  { %249 = vadd.xlane.f32.xlu0 %v248_v36 }
  0xad   :  { %v250_v37 = vpop.xlane.xlu0 %249 }
  0xae   :  { %v251_v38 = vrot.slane %v250_v37, 4 }
  0xb0   :  { %v252_v39 = vadd.f32 %v251_v38, %v250_v37 }
  0xb2   :  { %v253_v40 = vrot.slane %v252_v39, 2 }
  0xb4   :  { %v254_v41 = vadd.f32 %v253_v40, %v252_v39 }
  0xb6   :  { %v255_v42 = vrot.slane %v254_v41, 1 }
  0xb8   :  { %v256_v43 = vadd.f32 %v255_v42, %v254_v41 }
  0xba   :  { %283 = vpush %v256_v43 }
  0xeb   :  { %s284_s24 = spop %283 }
  0xec   :  { %s258_s25 = smul.f32 0.00048828125, %s284_s24 }
  0xee   :  { %v259_v5 = vstv %s258_s25 }
  0xef   :  { %260 = vst [vmem:[#allocation8] sm:$0xff] %v259_v5 }
  0xf0   :  { %271 = dma.vmem_to_hbm [thread:$0]  %s267_s1, 128, %s269_s23, [#allocation5]  }
  0xf1   :  { %382 = dma.done.wait [#allocation5], 128  }
  0xf2   :  { %383 = vsyncadd [#allocation5], 4294967168 }
  0xf3   :  { %276 = vsyncpa [#allocation4], 1 }
  0xf4   :  { %277 = vsyncpa [#allocation7], 1 }
  0xf5   :  { %278 = vsyncpa [#allocation5], 1 }

</bundles_post_ra>
